<compile_context>
chip_gen: v6e
topology: v6e:2x2x1
jax: 0.10.0
libtpu: 0.0.40
codegen_flags: <defaults>
</compile_context>

<pallas_src>
import jax
import jax.numpy as jnp
from jax.experimental import pallas as pl
from jax.experimental.pallas import tpu as pltpu


def permutation_tensor(n: int, assume_canonical_coords: bool = True) -> jnp.ndarray:
    """JAX port of HNN.permutation_tensor (used by time_derivative, not forward)."""
    if assume_canonical_coords:
        M = jnp.eye(n, dtype=jnp.float32)
        return jnp.concatenate([M[n // 2:], -M[: n // 2]], axis=0)
    # Levi-Civita-style construction (assume_canonical_coords=False branch)
    M = jnp.ones((n, n), dtype=jnp.float32) * (1.0 - jnp.eye(n, dtype=jnp.float32))
    M = M.at[::2].multiply(-1.0)
    M = M.at[:, ::2].multiply(-1.0)
    iu = jnp.triu_indices(n, k=1)
    M = M.at[iu].multiply(-1.0)
    return M


def _cdiv(a: int, b: int) -> int:
    return -(-a // b)


def _round_up(n: int, m: int) -> int:
    return _cdiv(n, m) * m


def hnn_mlp_kernel(xt_ref, w1t_ref, b1t_ref, w2t_ref, b2t_ref, w3t_ref, b3t_ref, yt_ref):
    """Transposed MLP: all activations lane-dense as (hidden, TILE_B) / (2, TILE_B)."""
    xt = xt_ref[...]                      # (input_dim, TILE_B)
    w1t = w1t_ref[...]                    # (hidden, input_dim)
    in_dim = w1t_ref.shape[1]             # static (2)

    # --- Layer 1 on the VPU: K is tiny, skip the MXU. Bias folded into term 0. ---
    z1 = w1t[:, 0:1] * xt[0:1, :] + b1t_ref[...]          # (hidden, TILE_B)
    for k in range(1, in_dim):                             # static unrolled (in_dim small)
        z1 = z1 + w1t[:, k:k + 1] * xt[k:k + 1, :]
    h1 = jnp.tanh(z1)                                      # lane-dense tanh (EUP)

    # --- Layer 2 on the MXU: (hidden, hidden) x (hidden, TILE_B). ---
    h2 = jnp.tanh(
        jnp.dot(w2t_ref[...], h1, preferred_element_type=jnp.float32) + b2t_ref[...]
    )                                                      # (hidden, TILE_B)

    # --- Layer 3 on the MXU: (2, hidden) x (hidden, TILE_B) -> lane-dense store. ---
    yt = jnp.dot(w3t_ref[...], h2, preferred_element_type=jnp.float32) + b3t_ref[...]
    yt_ref[...] = yt.astype(yt_ref.dtype)                  # (2, TILE_B), full-lane vst


def hnn_forward(x, params, *, tile_b_max: int = 512):
    """HNN.forward (baseline=False): run the MLP in Pallas, split into (F1, F2)."""
    w1, b1, w2, b2, w3, b3 = params
    batch, input_dim = x.shape
    hidden = w1.shape[1]
    out_dim = w3.shape[1]

    # Pad the batch to a multiple of 128 (lane width), then pick a tile size that
    # is a multiple of 128, at most tile_b_max, exactly divides the padded batch,
    # and gives >=2 grid steps when the batch is non-trivial (v7x megacore).
    padded_batch = _round_up(batch, 128)
    n_tiles = _cdiv(padded_batch, tile_b_max)
    if padded_batch >= 256:
        n_tiles = max(n_tiles, 2)
    tile_b = _round_up(_cdiv(padded_batch, n_tiles), 128)
    padded_batch = n_tiles * tile_b
    assert tile_b % 128 == 0  # (8,128) rule on the (2, tile_b) output block

    # Transposed, lane-dense operands (wrapper-side layout plumbing, cheap).
    xt = jnp.transpose(x)                                  # (input_dim, batch)
    if padded_batch != batch:
        xt = jnp.pad(xt, ((0, 0), (0, padded_batch - batch)))
    w1t = jnp.transpose(w1)                                # (hidden, input_dim)
    b1t = b1.reshape(hidden, 1)
    w2t = jnp.transpose(w2)                                # (hidden, hidden)
    b2t = b2.reshape(hidden, 1)
    w3t = jnp.transpose(w3)                                # (out_dim, hidden)
    b3t = b3.reshape(out_dim, 1)

    const_map = lambda i: (0, 0)
    cost = pl.CostEstimate(
        flops=2 * padded_batch * (input_dim * hidden + hidden * hidden + hidden * out_dim),
        transcendentals=2 * padded_batch * hidden,
        bytes_accessed=(
            padded_batch * input_dim * 4
            + padded_batch * out_dim * 4
            + (input_dim * hidden + hidden * hidden + hidden * out_dim
               + 2 * hidden + out_dim) * 4
        ),
    )

    yt = pl.pallas_call(
        hnn_mlp_kernel,
        out_shape=jax.ShapeDtypeStruct((out_dim, padded_batch), jnp.float32),
        grid=(n_tiles,),
        in_specs=[
            pl.BlockSpec((input_dim, tile_b), lambda i: (0, i)),   # xT: tiled over batch
            pl.BlockSpec((hidden, input_dim), const_map),          # w1^T: VMEM-resident
            pl.BlockSpec((hidden, 1), const_map),                  # b1^T: resident
            pl.BlockSpec((hidden, hidden), const_map),             # w2^T: resident
            pl.BlockSpec((hidden, 1), const_map),                  # b2^T: resident
            pl.BlockSpec((out_dim, hidden), const_map),            # w3^T: resident
            pl.BlockSpec((out_dim, 1), const_map),                 # b3^T: resident
        ],
        out_specs=pl.BlockSpec((out_dim, tile_b), lambda i: (0, i)),  # lane-dense yT
        compiler_params=pltpu.CompilerParams(
            dimension_semantics=("parallel",),
        ),
        cost_estimate=cost,
    )(xt, w1t, b1t, w2t, b2t, w3t, b3t)

    # Original module's check, expressed on the transposed output:
    # y must be [batch, 2]  <=>  yT must be [2, padded_batch].
    assert yt.ndim == 2 and yt.shape[0] == 2, \
        "Output tensor should have shape [batch_size, 2] (held transposed as [2, batch])"
    # torch.Tensor.split(1, 1) -> two [batch, 1] tensors; contiguous row slices here.
    F1 = yt[0, :batch].reshape(batch, 1)
    F2 = yt[1, :batch].reshape(batch, 1)
    return F1, F2


def init_params(key, input_dim, hidden_dim, output_dim=2):
    """Deterministic synthetic init (shapes match nn.Linear layers of the MLP)."""
    k1, k2, k3 = jax.random.split(key, 3)
    w1 = jax.random.normal(k1, (input_dim, hidden_dim), jnp.float32) * 0.1
    b1 = jnp.zeros((1, hidden_dim), jnp.float32)
    w2 = jax.random.normal(k2, (hidden_dim, hidden_dim), jnp.float32) * 0.1
    b2 = jnp.zeros((1, hidden_dim), jnp.float32)
    w3 = jax.random.normal(k3, (hidden_dim, output_dim), jnp.float32) * 0.1
    b3 = jnp.zeros((1, output_dim), jnp.float32)
    return (w1, b1, w2, b2, w3, b3)


def _reference_forward(x, params):
    """Pure-JAX reference of the MLP + split, for correctness checking."""
    w1, b1, w2, b2, w3, b3 = params
    h1 = jnp.tanh(x @ w1 + b1)
    h2 = jnp.tanh(h1 @ w2 + b2)
    y = h2 @ w3 + b3
    return y[:, 0:1], y[:, 1:2]


if __name__ == "__main__":
    # Small shapes consistent with the module: canonical coords (q, p) -> input_dim=2.
    batch = 8
    input_dim = 2
    hidden_dim = 32

    key = jax.random.PRNGKey(0)
    kx, kp = jax.random.split(key)
    x = jax.random.normal(kx, (batch, input_dim), jnp.float32)
    params = init_params(kp, input_dim, hidden_dim)

    # Permutation tensor from __init__ (used by time_derivative); plain JAX.
    M = permutation_tensor(input_dim, assume_canonical_coords=True)
    # TODO(synk): time_derivative requires autograd through the Pallas kernel
    # (custom VJP for the MLP); only forward() is implemented here.

    F1, F2 = hnn_forward(x, params)
    jax.block_until_ready((F1, F2))

    assert F1.shape == (batch, 1) and F2.shape == (batch, 1)
    assert M.shape == (input_dim, input_dim)

    # Numerical check against the pure-JAX reference.
    rF1, rF2 = _reference_forward(x, params)
    assert jnp.allclose(F1, rF1, rtol=1e-5, atol=1e-5)
    assert jnp.allclose(F2, rF2, rtol=1e-5, atol=1e-5)

    print("KERNEL_OK")
</pallas_src>

<mosaic_0001>
module attributes {stable_mosaic.version = 11 : i64} {
  func.func @hnn_mlp_kernel(%arg0: i32, %arg1: memref<2x128xf32, #tpu.memory_space<vmem>>, %arg2: memref<32x2xf32, #tpu.memory_space<vmem>>, %arg3: memref<32x1xf32, #tpu.memory_space<vmem>>, %arg4: memref<32x32xf32, #tpu.memory_space<vmem>>, %arg5: memref<32x1xf32, #tpu.memory_space<vmem>>, %arg6: memref<2x32xf32, #tpu.memory_space<vmem>>, %arg7: memref<2x1xf32, #tpu.memory_space<vmem>>, %arg8: memref<2x128xf32, #tpu.memory_space<vmem>>) attributes {dimension_semantics = [#tpu.dimension_semantics<parallel>], iteration_bounds = array<i64: 1>, scalar_prefetch = 0 : i64, scratch_operands = 0 : i64, tpu.core_type = #tpu.core_type<tc>, window_params = [{transform_indices = @transform_0, window_bounds = array<i64: 2, 128>}, {pipeline_mode = #tpu.pipeline_mode<synchronous>, transform_indices = @transform_1, window_bounds = array<i64: 32, 2>}, {pipeline_mode = #tpu.pipeline_mode<synchronous>, transform_indices = @transform_2, window_bounds = array<i64: 32, 1>}, {pipeline_mode = #tpu.pipeline_mode<synchronous>, transform_indices = @transform_3, window_bounds = array<i64: 32, 32>}, {pipeline_mode = #tpu.pipeline_mode<synchronous>, transform_indices = @transform_4, window_bounds = array<i64: 32, 1>}, {pipeline_mode = #tpu.pipeline_mode<synchronous>, transform_indices = @transform_5, window_bounds = array<i64: 2, 32>}, {pipeline_mode = #tpu.pipeline_mode<synchronous>, transform_indices = @transform_6, window_bounds = array<i64: 2, 1>}, {transform_indices = @transform_7, window_bounds = array<i64: 2, 128>}]} {
    %c0 = arith.constant 0 : index
    %c0_0 = arith.constant 0 : index
    %0 = vector.load %arg1[%c0, %c0_0] : memref<2x128xf32, #tpu.memory_space<vmem>>, vector<2x128xf32>
    %c0_1 = arith.constant 0 : index
    %c0_2 = arith.constant 0 : index
    %1 = vector.load %arg2[%c0_1, %c0_2] : memref<32x2xf32, #tpu.memory_space<vmem>>, vector<32x2xf32>
    %2 = vector.extract_strided_slice %1 {offsets = [0, 0], sizes = [32, 1], strides = [1, 1]} : vector<32x2xf32> to vector<32x1xf32>
    %3 = vector.extract_strided_slice %0 {offsets = [0, 0], sizes = [1, 128], strides = [1, 1]} : vector<2x128xf32> to vector<1x128xf32>
    %4 = vector.broadcast %2 : vector<32x1xf32> to vector<32x128xf32>
    %5 = vector.broadcast %3 : vector<1x128xf32> to vector<32x128xf32>
    %6 = arith.mulf %4, %5 : vector<32x128xf32>
    %c0_3 = arith.constant 0 : index
    %c0_4 = arith.constant 0 : index
    %7 = vector.load %arg3[%c0_3, %c0_4] : memref<32x1xf32, #tpu.memory_space<vmem>>, vector<32x1xf32>
    %8 = vector.broadcast %7 : vector<32x1xf32> to vector<32x128xf32>
    %9 = arith.addf %6, %8 : vector<32x128xf32>
    %10 = vector.extract_strided_slice %1 {offsets = [0, 1], sizes = [32, 1], strides = [1, 1]} : vector<32x2xf32> to vector<32x1xf32>
    %11 = vector.extract_strided_slice %0 {offsets = [1, 0], sizes = [1, 128], strides = [1, 1]} : vector<2x128xf32> to vector<1x128xf32>
    %12 = vector.broadcast %10 : vector<32x1xf32> to vector<32x128xf32>
    %13 = vector.broadcast %11 : vector<1x128xf32> to vector<32x128xf32>
    %14 = arith.mulf %12, %13 : vector<32x128xf32>
    %15 = arith.addf %9, %14 : vector<32x128xf32>
    %16 = math.tanh %15 : vector<32x128xf32>
    %c0_5 = arith.constant 0 : index
    %c0_6 = arith.constant 0 : index
    %17 = vector.load %arg4[%c0_5, %c0_6] : memref<32x32xf32, #tpu.memory_space<vmem>>, vector<32x32xf32>
    %cst = arith.constant dense<0.000000e+00> : vector<32x128xf32>
    %18 = tpu.matmul %17, %16, %cst {dimension_numbers = #tpu.dot_dimension_numbers<[1], [0], [0], [1], [0, 0, 1, 1], [], []>} : vector<32x32xf32>, vector<32x128xf32>, vector<32x128xf32> -> vector<32x128xf32>
    %c0_7 = arith.constant 0 : index
    %c0_8 = arith.constant 0 : index
    %19 = vector.load %arg5[%c0_7, %c0_8] : memref<32x1xf32, #tpu.memory_space<vmem>>, vector<32x1xf32>
    %20 = vector.broadcast %19 : vector<32x1xf32> to vector<32x128xf32>
    %21 = arith.addf %18, %20 : vector<32x128xf32>
    %22 = math.tanh %21 : vector<32x128xf32>
    %c0_9 = arith.constant 0 : index
    %c0_10 = arith.constant 0 : index
    %23 = vector.load %arg6[%c0_9, %c0_10] : memref<2x32xf32, #tpu.memory_space<vmem>>, vector<2x32xf32>
    %cst_11 = arith.constant dense<0.000000e+00> : vector<2x128xf32>
    %24 = tpu.matmul %23, %22, %cst_11 {dimension_numbers = #tpu.dot_dimension_numbers<[1], [0], [0], [1], [0, 0, 1, 1], [], []>} : vector<2x32xf32>, vector<32x128xf32>, vector<2x128xf32> -> vector<2x128xf32>
    %c0_12 = arith.constant 0 : index
    %c0_13 = arith.constant 0 : index
    %25 = vector.load %arg7[%c0_12, %c0_13] : memref<2x1xf32, #tpu.memory_space<vmem>>, vector<2x1xf32>
    %26 = vector.broadcast %25 : vector<2x1xf32> to vector<2x128xf32>
    %27 = arith.addf %24, %26 : vector<2x128xf32>
    %c0_14 = arith.constant 0 : index
    %c0_15 = arith.constant 0 : index
    %28 = vector.load %arg8[%c0_14, %c0_15] : memref<2x128xf32, #tpu.memory_space<vmem>>, vector<2x128xf32>
    tpu.vector_store %arg8[%c0_14, %c0_15], %27 {strides = array<i32>} : memref<2x128xf32, #tpu.memory_space<vmem>>, vector<2x128xf32>,
    return
  }
  func.func @transform_0(%arg0: i32) -> (i32, i32) {
    %c0_i32 = arith.constant 0 : i32
    %c0_i32_0 = arith.constant 0 : i32
    return %c0_i32, %arg0 : i32, i32
  }
  func.func @transform_1(%arg0: i32) -> (i32, i32) {
    %c0_i32 = arith.constant 0 : i32
    %c0_i32_0 = arith.constant 0 : i32
    %c0_i32_1 = arith.constant 0 : i32
    return %c0_i32, %c0_i32_0 : i32, i32
  }
  func.func @transform_2(%arg0: i32) -> (i32, i32) {
    %c0_i32 = arith.constant 0 : i32
    %c0_i32_0 = arith.constant 0 : i32
    %c0_i32_1 = arith.constant 0 : i32
    return %c0_i32, %c0_i32_0 : i32, i32
  }
  func.func @transform_3(%arg0: i32) -> (i32, i32) {
    %c0_i32 = arith.constant 0 : i32
    %c0_i32_0 = arith.constant 0 : i32
    %c0_i32_1 = arith.constant 0 : i32
    return %c0_i32, %c0_i32_0 : i32, i32
  }
  func.func @transform_4(%arg0: i32) -> (i32, i32) {
    %c0_i32 = arith.constant 0 : i32
    %c0_i32_0 = arith.constant 0 : i32
    %c0_i32_1 = arith.constant 0 : i32
    return %c0_i32, %c0_i32_0 : i32, i32
  }
  func.func @transform_5(%arg0: i32) -> (i32, i32) {
    %c0_i32 = arith.constant 0 : i32
    %c0_i32_0 = arith.constant 0 : i32
    %c0_i32_1 = arith.constant 0 : i32
    return %c0_i32, %c0_i32_0 : i32, i32
  }
  func.func @transform_6(%arg0: i32) -> (i32, i32) {
    %c0_i32 = arith.constant 0 : i32
    %c0_i32_0 = arith.constant 0 : i32
    %c0_i32_1 = arith.constant 0 : i32
    return %c0_i32, %c0_i32_0 : i32, i32
  }
  func.func @transform_7(%arg0: i32) -> (i32, i32) {
    %c0_i32 = arith.constant 0 : i32
    %c0_i32_0 = arith.constant 0 : i32
    return %c0_i32, %arg0 : i32, i32
  }
}

</mosaic_0001>

<bundles_post_ra>
// kernel: tpu_custom_call.1
= control target key start
LH: loop header
LB: loop body
LE: loop exit
PB: predicated region body
PF: predicated region fallthrough
CT: control target
= control target key end

     0   :  { %v437_v2 = vmov 0   ;;  %s547_s0 = inlined_call_operand.vmem [shape: f32[2,128], index: 0, kind: input, shape index: {}]   ;;  %s548_s1 = inlined_call_operand.vmem [shape: f32[32,2], index: 1, kind: input, shape index: {}]   ;;  %s549_s2 = inlined_call_operand.vmem [shape: f32[32,1], index: 2, kind: input, shape index: {}]   ;;  %s550_s3 = inlined_call_operand.vmem [shape: f32[32,32], index: 3, kind: input, shape index: {}]   ;;  %s551_s4 = inlined_call_operand.vmem [shape: f32[32,1], index: 4, kind: input, shape index: {}]   ;;  %s552_s5 = inlined_call_operand.vmem [shape: f32[2,32], index: 5, kind: input, shape index: {}]   ;;  %s553_s6 = inlined_call_operand.vmem [shape: f32[2,1], index: 6, kind: input, shape index: {}]   ;;  %s554_s7 = inlined_call_operand.hbm [shape: f32[2,128], index: 7, kind: output, shape index: {}]  }
   0x1   :  { %v63_v0 = vld [vmem:[%s549_s2 + $0x18] sm:$0xff]  ;;  %394 = vset.pattern.permute.xlu1 %v437_v2  ;;  %393 = vset.pattern.permute.xlu0 %v437_v2  ;;  %v30_v3 = vld [vmem:[%s548_s1 + $0x10] sm:$0xff] }
   0x2   :  { %v31_v1 = vld [vmem:[%s548_s1 + $0x18] sm:$0xff]  ;;  %81 = vperm.xlu1 %394, %v63_v0  }
   0x3   :  { %49 = vperm.xlu0 %393, %v31_v1  }
   0x4   :  { %12 = vsyncpa [#allocation3], 0  ;;  %v438_v4 = vmov 1   ;;  %v29_v5 = vld [vmem:[%s548_s1 + $0x8] sm:$0xff]  ;;  %v62_v6 = vld [vmem:[%s549_s2 + $0x10] sm:$0xff]  ;;  %vm148_vm0 = vcmask 261120   ;;  %v52_v16 = vlaneseq }
   0x5   :  { %v28_v7 = vld [vmem:[%s548_s1] sm:$0xff]  ;;  %v61_v8 = vld [vmem:[%s549_s2 + $0x8] sm:$0xff]  ;;  %v127_v10 = vld [vmem:[%s551_s4 + $0x18] sm:$0xff]  ;;  %v439_v58 = vmov 0.0   ;;  %vm440_vm1 = vmmov 0   ;;  %s441_s10 = smov [#allocation2]  }
   0x6   :  { %395 = vset.pattern.permute.xlu1 %v438_v4  ;;  %v60_v9 = vld [vmem:[%s549_s2] sm:$0xff]  ;;  %v125_v11 = vld [vmem:[%s551_s4 + $0x8] sm:$0xff]  ;;  %v126_v14 = vld [vmem:[%s551_s4 + $0x10] sm:$0xff]  ;;  %v53_v17 = vshrl.u32 %v52_v16, 7  ;;  %377 = vmatprep.subr.mxu1 %v439_v58  ;;  %s337_s11 = sshll.u32 %s441_s10, 4  ;;  %s338_s11 = int_to_ptr.vmem [resolvable:$true] %s337_s11 }
   0x7   :  { %44 = vperm.xlu0 %393, %v30_v3   ;;  %101 = vperm.xlu1 %395, %v31_v1   ;;  %v124_v12 = vld [vmem:[%s551_s4] sm:$0xff]  ;;  %v121_v55 = vld [vmem:[%s550_s3 + $0x8] sm:$0xff]  ;;  %v122_v56 = vld [vmem:[%s550_s3 + $0x10] sm:$0xff]  ;;  %s415_s12 = scalar_lea.vmem %s338_s11, 32  ;;  %p420_p1 = scmp.lt.s32.totalorder %s338_s11, %s338_s11 }
   0x8   :  { %v120_v13 = vld [vmem:[%s550_s3] sm:$0xff]  ;;  %v54_v18 = vsub.s32 0, %v53_v17  ;;  %v106_v21 = vsub.s32 1, %v53_v17  ;;  %v123_v57 = vld [vmem:[%s550_s3 + $0x18] sm:$0xff]  ;;  %385 = vmatprep.mubr.msk.f32.mxu1 %vm440_vm1, %v439_v58  ;;  %p416_p0 = scmp.ne.s32.totalorder %s338_s11, %s415_s12  ;;  %p421_p2 = scmp.lt.s32.totalorder %s415_s12, %s415_s12 }
   0x9   :  { %371 = vmatprep.mubr.msk.f32.mxu0 %vm148_vm0, %v120_v13  ;;  %v251_v15 = vld [vmem:[%s553_s6] sm:$0x3] }
   0xa   :  { %v27_v19 = vld [vmem:[%s547_s0] sm:$0x3]  ;;  %p422_p3 = por %p421_p2, %p420_p1 }
   0xb   :  { %39 = vperm.xlu0 %393, %v29_v5   ;;  %396 = vset.pattern.permute.xlu1 %v437_v2  ;;  %v55_v20 = vrot.slane %v27_v19, %v54_v18  ;;  %v107_v25 = vrot.slane %v27_v19, %v106_v21 }
   0xc   :  { %76 = vperm.xlu1 %396, %v62_v6   ;;  %p423_p4 = pnand %p422_p3, %p416_p0 }
   0xf   :  { %397 = vset.pattern.permute.xlu0 %v438_v4 }
  0x10   :  { %97 = vperm.xlu0 %397, %v30_v3   ;;  %34 = vperm.xlu1 %396, %v28_v7  }
  0x14   :  { %93 = vperm.xlu0 %397, %v29_v5   ;;  %71 = vperm.xlu1 %396, %v61_v8  }
  0x18   :  { %89 = vperm.xlu0 %397, %v28_v7   ;;  %66 = vperm.xlu1 %396, %v60_v9  }
  0x1c   :  { %398 = vset.pattern.permute.xlu0 %v437_v2  ;;  %145 = vperm.xlu1 %396, %v127_v10   ;;  %v250_v10 = vld [vmem:[%s552_s5] sm:$0x3] }
  0x1d   :  { %140 = vperm.xlu0 %398, %v126_v14  }
  0x20   :  { %135 = vperm.xlu1 %396, %v125_v11  }
  0x21   :  { %254 = vperm.xlu0 %398, %v251_v15  }
  0x24   :  { %130 = vperm.xlu1 %396, %v124_v12  }
  0x7d   :  { %v82_v22 = vpop.permute.xlu1 %81 }
  0x7e   :  { %v50_v23 = vpop.permute.xlu0 %49 }
  0x7f   :  { %v59_v24 = vmul.f32 %v55_v20, %v50_v23 }
  0x81   :  { %v87_v28 = vadd.f32 %v82_v22, %v59_v24 }
  0x82   :  { %v45_v26 = vpop.permute.xlu0 %44  ;;  %v102_v27 = vpop.permute.xlu1 %101 }
  0x83   :  { %v111_v29 = vmul.f32 %v107_v25, %v102_v27  ;;  %v58_v33 = vmul.f32 %v55_v20, %v45_v26 }
  0x85   :  { %v115_v30 = vadd.f32 %v111_v29, %v87_v28 }
  0x86   :  { %v40_v31 = vpop.permute.xlu0 %39 }
  0x87   :  { %399 = vtanh.f32 %v115_v30  ;;  %v77_v32 = vpop.permute.xlu1 %76  ;;  %v57_v39 = vmul.f32 %v55_v20, %v40_v31 }
  0x88   :  { %v86_v35 = vadd.f32 %v77_v32, %v58_v33 }
  0x8b   :  { %v98_v34 = vpop.permute.xlu0 %97  ;;  %v35_v37 = vpop.permute.xlu1 %34 }
  0x8c   :  { %v110_v36 = vmul.f32 %v107_v25, %v98_v34  ;;  %v56_v44 = vmul.f32 %v55_v20, %v35_v37 }
  0x8e   :  { %v114_v38 = vadd.f32 %v110_v36, %v86_v35 }
  0x8f   :  { %v94_v40 = vpop.permute.xlu0 %93  ;;  %v72_v42 = vpop.permute.xlu1 %71 }
  0x90   :  { %401 = vtanh.f32 %v114_v38  ;;  %v109_v41 = vmul.f32 %v107_v25, %v94_v40  ;;  %v85_v43 = vadd.f32 %v72_v42, %v57_v39 }
  0x92   :  { %v113_v45 = vadd.f32 %v109_v41, %v85_v43 }
  0x93   :  { %v90_v46 = vpop.permute.xlu0 %89  ;;  %v67_v48 = vpop.permute.xlu1 %66 }
  0x94   :  { %v108_v47 = vmul.f32 %v107_v25, %v90_v46  ;;  %v400_v49 = vpop.eup %399  ;;  %403 = vtanh.f32 %v113_v45  ;;  %v84_v50 = vadd.f32 %v67_v48, %v56_v44 }
  0x95   :  { %363 = vmatprep.subr.mxu0 %v400_v49 }
  0x96   :  { %v112_v51 = vadd.f32 %v108_v47, %v84_v50  ;;  %364 = vmatpush3.msra.mxu0 %v400_v49 }
  0x97   :  { %v146_v59 = vpop.permute.xlu1 %145 }
  0x98   :  { %405 = vtanh.f32 %v112_v51  ;;  %v141_v1 = vpop.permute.xlu0 %140 }
  0x9b   :  { %v136_v61 = vpop.permute.xlu1 %135 }
  0x9c   :  { %v255_v12 = vpop.permute.xlu0 %254 }
  0x9d   :  { %v402_v52 = vpop.eup %401 }
  0x9e   :  { %365 = vmatprep.subr.mxu0 %v402_v52 }
  0x9f   :  { %366 = vmatpush3.msra.mxu0 %v402_v52  ;;  %v131_v5 = vpop.permute.xlu1 %130 }
  0xa1   :  { %v404_v53 = vpop.eup %403 }
  0xa2   :  { %367 = vmatprep.subr.mxu0 %v404_v53 }
  0xa3   :  { %368 = vmatpush3.msra.mxu0 %v404_v53 }
  0xa5   :  { %v406_v54 = vpop.eup %405 }
  0xa6   :  { %369 = vmatprep.subr.mxu0 %v406_v54 }
  0xa7   :  { %370 = vmatpush3.msra.mxu0 %v406_v54 }
  0xa8   :  { %372 = vmatmul.mubr.msk.f32.vlgmr.msra.gmra.mxu0 %vm148_vm0, %v121_v55 }
  0xa9   :  { %374 = vmatprep.mubr.msk.f32.mxu0 %vm148_vm0, %v122_v56 }
  0xac   :  { %375 = vmatmul.mubr.msk.f32.gmra.mxu0 %vm148_vm0, %v123_v57 }
 0x168   :  { %v373_v60 = vpop.f32.mrf.mxu0 }
 0x169   :  { %v233_v3 = vadd.f32 %v373_v60, %v136_v61 }
 0x16a   :  { %v227_v62 = vpop.f32.mrf.mxu0 }
 0x16b   :  { %v228_v6 = vadd.f32 %v227_v62, %v131_v5 }
 0x16c   :  { %v376_v63 = vpop.f32.mrf.mxu0 }
 0x16d   :  { %v243_v0 = vadd.f32 %v376_v63, %v146_v59 }
 0x16e   :  { %v237_v2 = vpop.f32.mrf.mxu0 }
 0x16f   :  { %407 = vtanh.f32 %v243_v0  ;;  %v238_v4 = vadd.f32 %v237_v2, %v141_v1 }
 0x171   :  { %409 = vtanh.f32 %v238_v4 }
 0x172   :  { %411 = vtanh.f32 %v233_v3 }
 0x173   :  { %413 = vtanh.f32 %v228_v6 }
 0x17c   :  { %v408_v7 = vpop.eup %407 }
 0x17d   :  { %378 = vmatpush3.msra.mxu1 %v408_v7 }
 0x17e   :  { %v410_v8 = vpop.eup %409  ;;  %379 = vmatprep.subr.mxu1 %v439_v58 }
 0x17f   :  { %380 = vmatpush3.msra.mxu1 %v410_v8  ;;  %v412_v9 = vpop.eup %411 }
 0x180   :  { %381 = vmatprep.subr.mxu1 %v439_v58  ;;  %v414_v11 = vpop.eup %413 }
 0x181   :  { %382 = vmatpush3.msra.mxu1 %v412_v9 }
 0x182   :  { %383 = vmatprep.subr.mxu1 %v439_v58 }
 0x183   :  { %384 = vmatpush3.msra.mxu1 %v414_v11 }
 0x184   :  { %386 = vmatmul.mubr.msk.f32.vlgmr.msra.gmra.mxu1 %vm148_vm0, %v250_v10 }
 0x244   :  { %v326_v13 = vpop.f32.mrf.mxu1 }
 0x245   :  { %v327_v14 = vadd.f32 %v326_v13, %v255_v12 }
 0x246   :  { %v387_v15 = vpop.f32.mrf.mxu1 }
 0x247   :  { %330 = vst [vmem:[#allocation2] sm:$0x3] %v327_v14 }
 0x248   :  { %426 = shalt.err (!%p423_p4)
}
 0x249   :  { %340 = dma.vmem_to_hbm [thread:$0]  %s338_s11, 32, %s554_s7, [#allocation3]  }
 0x24a   :  { %435 = dma.done.wait [#allocation3], 32  }
 0x24b   :  { %436 = vsyncadd [#allocation3], 4294967264 }
 0x24c   :  { %344 = vsyncpa [#allocation3], 1 }

</bundles_post_ra>
